<compile_context>
chip_gen: v6e
topology: v6e:2x2x1
jax: 0.10.0
libtpu: 0.0.40
codegen_flags: <defaults>
</compile_context>

<pallas_src>
import functools

import jax
import jax.numpy as jnp
from jax.experimental import pallas as pl
from jax.experimental.pallas import tpu as pltpu


def _round_up(x, m):
    return (x + m - 1) // m * m


# ---------------------------------------------------------------------------
# Parameter slab packing.
#
# Slab layout, shape (2*H + round_up(D_out, 8), H + 1), float32:
#   rows [0      , H      ), cols [0, D_in) : W0^T   (H, D_in)
#   rows [H      , 2H     ), cols [0, H   ) : W1^T   (H, H)
#   rows [2H     , 2H+D_o ), cols [0, H   ) : W2^T   (D_out, H)
#   column H holds the bias of the corresponding row block.
# Weights are stored pre-transposed exactly as consumed by the kernel.
# ---------------------------------------------------------------------------
def _pack_params(w0, b0, w1, b1, w2, b2):
    d_in, d_h = w0.shape
    d_out = w2.shape[1]
    rows = 2 * d_h + _round_up(d_out, 8)
    slab = jnp.zeros((rows, d_h + 1), jnp.float32)
    slab = slab.at[0:d_h, 0:d_in].set(w0.T.astype(jnp.float32))
    slab = slab.at[0:d_h, d_h].set(b0.reshape(-1).astype(jnp.float32))
    slab = slab.at[d_h:2 * d_h, 0:d_h].set(w1.T.astype(jnp.float32))
    slab = slab.at[d_h:2 * d_h, d_h].set(b1.reshape(-1).astype(jnp.float32))
    slab = slab.at[2 * d_h:2 * d_h + d_out, 0:d_h].set(w2.T.astype(jnp.float32))
    slab = slab.at[2 * d_h:2 * d_h + d_out, d_h].set(b2.reshape(-1).astype(jnp.float32))
    return slab


# ---------------------------------------------------------------------------
# Pallas kernel: fused 3-layer MLP (2 hidden ReLU layers) + sigmoid epilogue,
# computed in transposed orientation (rows on the lane axis).
# ---------------------------------------------------------------------------
def _make_mlp_kernel(d_in, d_hidden, d_out):
    r1 = d_hidden            # row offset of layer-1 block in the slab
    r2 = 2 * d_hidden        # row offset of layer-2 block in the slab
    bcol = d_hidden          # lane index of the bias column

    def kernel(x_ref, p_ref, o_ref):
        # x tile in natural layout (tile_m, d_in); cast is in-register only.
        x = x_ref[...].astype(jnp.float32)

        w0t = p_ref[0:d_hidden, 0:d_in]               # (H, d_in)
        b0 = p_ref[0:d_hidden, bcol:bcol + 1]         # (H, 1)
        w1t = p_ref[r1:r1 + d_hidden, 0:d_hidden]     # (H, H)
        b1 = p_ref[r1:r1 + d_hidden, bcol:bcol + 1]
        w2t = p_ref[r2:r2 + d_out, 0:d_hidden]        # (d_out, H)
        b2 = p_ref[r2:r2 + d_out, bcol:bcol + 1]

        # Layer 0: NT contraction over the feature axis -> (H, tile_m).
        h = jax.lax.dot_general(w0t, x, (((1,), (1,)), ((), ())),
                                preferred_element_type=jnp.float32)
        h = jnp.maximum(h + b0, 0.0)                                    # ReLU

        # Layer 1: (H, H) @ (H, tile_m) -> (H, tile_m).
        h = jnp.dot(w1t, h, preferred_element_type=jnp.float32)
        h = jnp.maximum(h + b1, 0.0)                                    # ReLU

        # Layer 2: (d_out, H) @ (H, tile_m) -> (d_out, tile_m).
        y = jnp.dot(w2t, h, preferred_element_type=jnp.float32) + b2

        o_ref[...] = jax.nn.sigmoid(y)          # torch.sigmoid(.float()), f32

    return kernel


@functools.partial(jax.jit, static_argnames=("tile_m",))
def volume_material_forward(features, params, *, tile_m=4096):
    """features: (..., D_in) float array.  Returns (..., D_out) float32."""
    w0, b0, w1, b1, w2, b2 = params
    d_in, d_hidden = w0.shape
    d_out = w2.shape[1]

    lead_shape = features.shape[:-1]
    x = features.reshape(-1, d_in)             # == features.view(-1, D_in)
    n = x.shape[0]

    # Row tile: as large as allowed (amortizes per-step overhead), clamped to
    # the problem size.  Must be a multiple of 128 because it is the *lane*
    # axis of the transposed output block.
    tm = min(_round_up(tile_m, 128), _round_up(n, 128))
    grid = (pl.cdiv(n, tm),)                   # ragged last block: no padding

    slab = _pack_params(w0, b0, w1, b1, w2, b2)
    kernel = _make_mlp_kernel(d_in, d_hidden, d_out)

    out_t = pl.pallas_call(
        kernel,
        out_shape=jax.ShapeDtypeStruct((d_out, n), jnp.float32),
        grid_spec=pltpu.PrefetchScalarGridSpec(
            num_scalar_prefetch=0,
            grid=grid,
            in_specs=[
                # Row tile of features, natural (HBM-contiguous) layout.
                pl.BlockSpec((tm, d_in), lambda i: (i, 0)),
                # Single resident weight+bias slab (constant index map).
                pl.BlockSpec(slab.shape, lambda i: (0, 0)),
            ],
            # Transposed output: rows on the lane axis -> lane-dense stores.
            out_specs=pl.BlockSpec((d_out, tm), lambda i: (0, i)),
        ),
        compiler_params=pltpu.CompilerParams(
            dimension_semantics=("parallel",)),
    )(x, slab)

    # Layout plumbing back to the PyTorch output layout (..., D_out).
    return out_t.T.reshape(*lead_shape, d_out)


# ---------------------------------------------------------------------------
# Deterministic parameter construction (synthetic init — no checkpoint load).
# VanillaMLP: Linear(D_in,H) -> ReLU -> Linear(H,H) -> ReLU -> Linear(H,D_out),
# sigmoid applied in forward.  Weights stored (in, out) so y = x @ W + b.
# ---------------------------------------------------------------------------
def init_params(key, d_in, d_hidden, d_out):
    k0, k1, k2 = jax.random.split(key, 3)
    scale0 = 1.0 / jnp.sqrt(d_in)
    scale1 = 1.0 / jnp.sqrt(d_hidden)
    w0 = jax.random.uniform(k0, (d_in, d_hidden), jnp.float32, -scale0, scale0)
    b0 = jnp.zeros((1, d_hidden), jnp.float32)
    w1 = jax.random.uniform(k1, (d_hidden, d_hidden), jnp.float32, -scale1, scale1)
    b1 = jnp.zeros((1, d_hidden), jnp.float32)
    w2 = jax.random.uniform(k2, (d_hidden, d_out), jnp.float32, -scale1, scale1)
    b2 = jnp.zeros((1, d_out), jnp.float32)
    return (w0, b0, w1, b1, w2, b2)


def reference_forward(features, params):
    """Pure-JAX reference (mirrors the PyTorch forward) for a correctness check."""
    w0, b0, w1, b1, w2, b2 = params
    x = features.reshape(-1, features.shape[-1]).astype(jnp.float32)
    h = jnp.maximum(x @ w0 + b0, 0.0)
    h = jnp.maximum(h @ w1 + b1, 0.0)
    y = h @ w2 + b2
    y = jax.nn.sigmoid(y)
    return y.reshape(*features.shape[:-1], w2.shape[1])


if __name__ == "__main__":
    # Config-implied small shapes:
    #   input_feature_dim = 16, output_feature_dim = 8 (kd3+rough1+metal1+occ3),
    #   mlp hidden = 32, 2 hidden layers.
    D_IN, D_HIDDEN, D_OUT = 16, 32, 8
    key = jax.random.PRNGKey(0)
    k_feat1, k_feat2, k_param = jax.random.split(key, 3)
    params = init_params(k_param, D_IN, D_HIDDEN, D_OUT)

    # Test 1: exact-fit single tile, batch of rays (2, 64, 16).
    features = jax.random.normal(k_feat1, (2, 64, D_IN), dtype=jnp.float32)
    out = jax.block_until_ready(volume_material_forward(features, params))
    ref = reference_forward(features, params)
    assert out.shape == (2, 64, D_OUT)
    assert out.dtype == jnp.float32
    assert jnp.allclose(out, ref, atol=2e-5, rtol=2e-5)

    # Test 2: multi-block grid with a ragged last block (no wrapper padding).
    features2 = jax.random.normal(k_feat2, (2, 1250, D_IN), dtype=jnp.float32)
    out2 = jax.block_until_ready(
        volume_material_forward(features2, params, tile_m=1024))
    ref2 = reference_forward(features2, params)
    assert out2.shape == (2, 1250, D_OUT)
    assert jnp.allclose(out2, ref2, atol=2e-5, rtol=2e-5)

    print("KERNEL_OK")
</pallas_src>

<mosaic_0001>
module attributes {stable_mosaic.version = 11 : i64} {
  func.func @kernel(%arg0: i32, %arg1: memref<128x16xf32, #tpu.memory_space<vmem>>, %arg2: memref<72x33xf32, #tpu.memory_space<vmem>>, %arg3: memref<8x128xf32, #tpu.memory_space<vmem>>) attributes {dimension_semantics = [#tpu.dimension_semantics<parallel>], iteration_bounds = array<i64: 1>, scalar_prefetch = 0 : i64, scratch_operands = 0 : i64, tpu.core_type = #tpu.core_type<tc>, window_params = [{transform_indices = @transform_0, window_bounds = array<i64: 128, 16>}, {pipeline_mode = #tpu.pipeline_mode<synchronous>, transform_indices = @transform_1, window_bounds = array<i64: 72, 33>}, {transform_indices = @transform_2, window_bounds = array<i64: 8, 128>}]} {
    %c0 = arith.constant 0 : index
    %c0_0 = arith.constant 0 : index
    %0 = vector.load %arg1[%c0, %c0_0] : memref<128x16xf32, #tpu.memory_space<vmem>>, vector<128x16xf32>
    %c0_1 = arith.constant 0 : index
    %c0_2 = arith.constant 0 : index
    %1 = vector.load %arg2[%c0_1, %c0_2] : memref<72x33xf32, #tpu.memory_space<vmem>>, vector<32x16xf32>
    %c0_3 = arith.constant 0 : index
    %c32 = arith.constant 32 : index
    %2 = vector.load %arg2[%c0_3, %c32] : memref<72x33xf32, #tpu.memory_space<vmem>>, vector<32x1xf32>
    %c32_4 = arith.constant 32 : index
    %c0_5 = arith.constant 0 : index
    %3 = vector.load %arg2[%c32_4, %c0_5] : memref<72x33xf32, #tpu.memory_space<vmem>>, vector<32x32xf32>
    %c32_6 = arith.constant 32 : index
    %c32_7 = arith.constant 32 : index
    %4 = vector.load %arg2[%c32_6, %c32_7] : memref<72x33xf32, #tpu.memory_space<vmem>>, vector<32x1xf32>
    %c64 = arith.constant 64 : index
    %c0_8 = arith.constant 0 : index
    %5 = vector.load %arg2[%c64, %c0_8] : memref<72x33xf32, #tpu.memory_space<vmem>>, vector<8x32xf32>
    %c64_9 = arith.constant 64 : index
    %c32_10 = arith.constant 32 : index
    %6 = vector.load %arg2[%c64_9, %c32_10] : memref<72x33xf32, #tpu.memory_space<vmem>>, vector<8x1xf32>
    %cst = arith.constant dense<0.000000e+00> : vector<32x128xf32>
    %7 = tpu.matmul %1, %0, %cst {dimension_numbers = #tpu.dot_dimension_numbers<[1], [1], [0], [0], [0, 0, 1, 0], [], []>} : vector<32x16xf32>, vector<128x16xf32>, vector<32x128xf32> -> vector<32x128xf32>
    %8 = vector.broadcast %2 : vector<32x1xf32> to vector<32x128xf32>
    %9 = arith.addf %7, %8 : vector<32x128xf32>
    %cst_11 = arith.constant 0.000000e+00 : f32
    %10 = vector.broadcast %cst_11 : f32 to vector<32x128xf32>
    %11 = arith.maximumf %9, %10 : vector<32x128xf32>
    %cst_12 = arith.constant dense<0.000000e+00> : vector<32x128xf32>
    %12 = tpu.matmul %3, %11, %cst_12 {dimension_numbers = #tpu.dot_dimension_numbers<[1], [0], [0], [1], [0, 0, 1, 1], [], []>} : vector<32x32xf32>, vector<32x128xf32>, vector<32x128xf32> -> vector<32x128xf32>
    %13 = vector.broadcast %4 : vector<32x1xf32> to vector<32x128xf32>
    %14 = arith.addf %12, %13 : vector<32x128xf32>
    %cst_13 = arith.constant 0.000000e+00 : f32
    %15 = vector.broadcast %cst_13 : f32 to vector<32x128xf32>
    %16 = arith.maximumf %14, %15 : vector<32x128xf32>
    %cst_14 = arith.constant dense<0.000000e+00> : vector<8x128xf32>
    %17 = tpu.matmul %5, %16, %cst_14 {dimension_numbers = #tpu.dot_dimension_numbers<[1], [0], [0], [1], [0, 0, 1, 1], [], []>} : vector<8x32xf32>, vector<32x128xf32>, vector<8x128xf32> -> vector<8x128xf32>
    %18 = vector.broadcast %6 : vector<8x1xf32> to vector<8x128xf32>
    %19 = arith.addf %17, %18 : vector<8x128xf32>
    %20 = arith.negf %19 : vector<8x128xf32>
    %21 = math.exp %20 : vector<8x128xf32>
    %cst_15 = arith.constant 1.000000e+00 : f32
    %22 = vector.broadcast %cst_15 : f32 to vector<8x128xf32>
    %23 = arith.addf %22, %21 : vector<8x128xf32>
    %24 = arith.divf %22, %23 : vector<8x128xf32>
    %c0_16 = arith.constant 0 : index
    %c0_17 = arith.constant 0 : index
    %25 = vector.load %arg3[%c0_16, %c0_17] : memref<8x128xf32, #tpu.memory_space<vmem>>, vector<8x128xf32>
    tpu.vector_store %arg3[%c0_16, %c0_17], %24 {strides = array<i32>} : memref<8x128xf32, #tpu.memory_space<vmem>>, vector<8x128xf32>,
    return
  }
  func.func @transform_0(%arg0: i32) -> (i32, i32) {
    %c0_i32 = arith.constant 0 : i32
    %c0_i32_0 = arith.constant 0 : i32
    return %arg0, %c0_i32 : i32, i32
  }
  func.func @transform_1(%arg0: i32) -> (i32, i32) {
    %c0_i32 = arith.constant 0 : i32
    %c0_i32_0 = arith.constant 0 : i32
    %c0_i32_1 = arith.constant 0 : i32
    return %c0_i32, %c0_i32_0 : i32, i32
  }
  func.func @transform_2(%arg0: i32) -> (i32, i32) {
    %c0_i32 = arith.constant 0 : i32
    %c0_i32_0 = arith.constant 0 : i32
    return %c0_i32, %arg0 : i32, i32
  }
}

</mosaic_0001>

<bundles_post_ra>
// kernel: volume_material_forward.1
= control target key start
LH: loop header
LB: loop body
LE: loop exit
PB: predicated region body
PF: predicated region fallthrough
CT: control target
= control target key end

     0   :  { %vm56_vm0 = vcmask 130048   ;;  %v539_v2 = vmov 32   ;;  %vm222_vm1 = vcmask 261120   ;;  %v540_v42 = vmov 0.0   ;;  %s692_s0 = inlined_call_operand.vmem [shape: f32[128,16], index: 0, kind: input, shape index: {}]   ;;  %s693_s1 = inlined_call_operand.vmem [shape: f32[72,33], index: 1, kind: input, shape index: {}]   ;;  %s694_s2 = inlined_call_operand.vmem [shape: f32[8,128], index: 2, kind: output, shape index: {}]  }
   0x1   :  { %v26_v0 = vld [vmem:[%s692_s0 + $0x78] sm:$0xff]  ;;  %v25_v1 = vld [vmem:[%s692_s0 + $0x70] sm:$0xff]  ;;  %533 = vset.pattern.permute.xlu0 %v539_v2  ;;  %534 = vset.pattern.permute.xlu1 %v539_v2  ;;  %v24_v3 = vld [vmem:[%s692_s0 + $0x68] sm:$0xff]  ;;  %vm541_vm2 = vmmov 0  }
   0x2   :  { %467 = vmatprep.subr.msk.mxu0 %vm56_vm0, %v26_v0  ;;  %v27_v4 = vld [vmem:[%s693_s1] sm:$0xff]  ;;  %v30_v5 = vld [vmem:[%s693_s1 + $0x18] sm:$0xff]  ;;  %v28_v6 = vld [vmem:[%s693_s1 + $0x8] sm:$0xff] }
   0x3   :  { %468 = vmatpush3.xpose.msk.msra.mxu0 %vm56_vm0, %v26_v0  ;;  %499 = vmatprep.mubr.msk.f32.mxu0 %vm56_vm0, %v27_v4  ;;  %v23_v7 = vld [vmem:[%s692_s0 + $0x60] sm:$0xff]  ;;  %v29_v8 = vld [vmem:[%s693_s1 + $0x10] sm:$0xff]  ;;  %v22_v9 = vld [vmem:[%s692_s0 + $0x58] sm:$0xff] }
   0x4   :  { %469 = vmatprep.subr.msk.mxu0 %vm56_vm0, %v25_v1  ;;  %53 = vperm.xlu0 %533, %v30_v5   ;;  %v595_v10 = vld [vmem:[%s693_s1 + $0x38] sm:$0xff]  ;;  %v600_v11 = vld [vmem:[%s693_s1 + $0x30] sm:$0xff]  ;;  %v611_v13 = vld [vmem:[%s693_s1 + $0x28] sm:$0xff] }
   0x5   :  { %43 = vperm.xlu1 %534, %v28_v6   ;;  %v21_v12 = vld [vmem:[%s692_s0 + $0x50] sm:$0xff]  ;;  %v31_v14 = vld [vmem:[%s693_s1 + $0x20] sm:$0xff]  ;;  %v20_v15 = vld [vmem:[%s692_s0 + $0x48] sm:$0xff] }
   0x6   :  { %v626_v16 = vld [vmem:[%s693_s1 + $0x40] sm:$0xff]  ;;  %v18_v18 = vld [vmem:[%s692_s0 + $0x38] sm:$0xff]  ;;  %v17_v19 = vld [vmem:[%s692_s0 + $0x30] sm:$0xff]  ;;  %513 = vmatprep.mubr.msk.f32.mxu1 %vm222_vm1, %v31_v14 }
   0x7   :  { %470 = vmatpush3.xpose.msk.msra.mxu0 %vm56_vm0, %v25_v1  ;;  %v19_v17 = vld [vmem:[%s692_s0 + $0x40] sm:$0xff]  ;;  %v16_v20 = vld [vmem:[%s692_s0 + $0x28] sm:$0xff]  ;;  %v14_v22 = vld [vmem:[%s692_s0 + $0x18] sm:$0xff] }
   0x8   :  { %471 = vmatprep.subr.msk.mxu0 %vm56_vm0, %v24_v3  ;;  %48 = vperm.xlu0 %533, %v29_v8   ;;  %v15_v21 = vld [vmem:[%s692_s0 + $0x20] sm:$0xff]  ;;  %v13_v23 = vld [vmem:[%s692_s0 + $0x10] sm:$0xff]  ;;  %v12_v24 = vld [vmem:[%s692_s0 + $0x8] sm:$0xff] }
   0x9   :  { %38 = vperm.xlu1 %534, %v27_v4   ;;  %v11_v25 = vld [vmem:[%s692_s0] sm:$0xff] }
   0xb   :  { %472 = vmatpush3.xpose.msk.msra.mxu0 %vm56_vm0, %v24_v3 }
   0xc   :  { %473 = vmatprep.subr.msk.mxu0 %vm56_vm0, %v23_v7  ;;  %219 = vperm.xlu0 %533, %v595_v10  }
   0xd   :  { %214 = vperm.xlu1 %534, %v600_v11  }
   0xf   :  { %474 = vmatpush3.xpose.msk.msra.mxu0 %vm56_vm0, %v23_v7 }
  0x10   :  { %475 = vmatprep.subr.msk.mxu0 %vm56_vm0, %v22_v9  ;;  %209 = vperm.xlu0 %533, %v611_v13  }
  0x11   :  { %204 = vperm.xlu1 %534, %v31_v14  }
  0x13   :  { %476 = vmatpush3.xpose.msk.msra.mxu0 %vm56_vm0, %v22_v9 }
  0x14   :  { %477 = vmatprep.subr.msk.mxu0 %vm56_vm0, %v21_v12  ;;  %322 = vperm.xlu0 %533, %v626_v16  }
  0x17   :  { %478 = vmatpush3.xpose.msk.msra.mxu0 %vm56_vm0, %v21_v12 }
  0x18   :  { %479 = vmatprep.subr.msk.mxu0 %vm56_vm0, %v20_v15 }
  0x1b   :  { %480 = vmatpush3.xpose.msk.msra.mxu0 %vm56_vm0, %v20_v15 }
  0x1c   :  { %481 = vmatprep.subr.msk.mxu0 %vm56_vm0, %v19_v17 }
  0x1f   :  { %482 = vmatpush3.xpose.msk.msra.mxu0 %vm56_vm0, %v19_v17 }
  0x20   :  { %483 = vmatprep.subr.msk.mxu0 %vm56_vm0, %v18_v18 }
  0x23   :  { %484 = vmatpush3.xpose.msk.msra.mxu0 %vm56_vm0, %v18_v18 }
  0x24   :  { %485 = vmatprep.subr.msk.mxu0 %vm56_vm0, %v17_v19 }
  0x27   :  { %486 = vmatpush3.xpose.msk.msra.mxu0 %vm56_vm0, %v17_v19 }
  0x28   :  { %487 = vmatprep.subr.msk.mxu0 %vm56_vm0, %v16_v20 }
  0x2b   :  { %488 = vmatpush3.xpose.msk.msra.mxu0 %vm56_vm0, %v16_v20 }
  0x2c   :  { %489 = vmatprep.subr.msk.mxu0 %vm56_vm0, %v15_v21 }
  0x2f   :  { %490 = vmatpush3.xpose.msk.msra.mxu0 %vm56_vm0, %v15_v21 }
  0x30   :  { %491 = vmatprep.subr.msk.mxu0 %vm56_vm0, %v14_v22 }
  0x33   :  { %492 = vmatpush3.xpose.msk.msra.mxu0 %vm56_vm0, %v14_v22 }
  0x34   :  { %493 = vmatprep.subr.msk.mxu0 %vm56_vm0, %v13_v23 }
  0x37   :  { %494 = vmatpush3.xpose.msk.msra.mxu0 %vm56_vm0, %v13_v23 }
  0x38   :  { %495 = vmatprep.subr.msk.mxu0 %vm56_vm0, %v12_v24 }
  0x3b   :  { %496 = vmatpush3.xpose.msk.msra.mxu0 %vm56_vm0, %v12_v24 }
  0x3c   :  { %497 = vmatprep.subr.msk.mxu0 %vm56_vm0, %v11_v25 }
  0x3f   :  { %498 = vmatpush3.xpose.msk.msra.mxu0 %vm56_vm0, %v11_v25 }
  0x42   :  { %500 = vmatmul.mubr.msk.f32.vlgmr.msra.gmra.mxu0 %vm56_vm0, %v28_v6 }
  0x43   :  { %502 = vmatprep.mubr.msk.f32.mxu0 %vm56_vm0, %v29_v8 }
  0x46   :  { %503 = vmatmul.mubr.msk.f32.gmra.mxu0 %vm56_vm0, %v30_v5 }
  0x7f   :  { %v54_v26 = vpop.permute.xlu0 %53 }
  0x80   :  { %v44_v28 = vpop.permute.xlu1 %43 }
  0x83   :  { %v49_v32 = vpop.permute.xlu0 %48 }
  0x84   :  { %v39_v37 = vpop.permute.xlu1 %38 }
  0x87   :  { %v220_v43 = vpop.permute.xlu0 %219 }
  0x88   :  { %v215_v45 = vpop.permute.xlu1 %214 }
  0x8b   :  { %v210_v49 = vpop.permute.xlu0 %209 }
  0x8c   :  { %v205_v54 = vpop.permute.xlu1 %204 }
  0x8f   :  { %v323_v59 = vpop.permute.xlu0 %322 }
 0x102   :  { %v501_v27 = vpop.f32.mrf.mxu0 }
 0x103   :  { %v185_v34 = vadd.f32 %v501_v27, %v44_v28 }
 0x104   :  { %v179_v29 = vpop.f32.mrf.mxu0 }
 0x105   :  { %v180_v38 = vadd.f32 %v179_v29, %v39_v37  ;;  %v199_v40 = vmax.f32 %v185_v34, 0.0 }
 0x106   :  { %v504_v30 = vpop.f32.mrf.mxu0 }
 0x107   :  { %v195_v31 = vadd.f32 %v504_v30, %v54_v26  ;;  %v198_v41 = vmax.f32 %v180_v38, 0.0 }
 0x108   :  { %v189_v33 = vpop.f32.mrf.mxu0 }
 0x109   :  { %v201_v35 = vmax.f32 %v195_v31, 0.0  ;;  %v190_v36 = vadd.f32 %v189_v33, %v49_v32 }
 0x10b   :  { %v200_v39 = vmax.f32 %v190_v36, 0.0  ;;  %505 = vmatprep.subr.mxu1 %v201_v35 }
 0x10c   :  { %506 = vmatpush3.msra.mxu1 %v201_v35 }
 0x10d   :  { %507 = vmatprep.subr.mxu1 %v200_v39 }
 0x10e   :  { %508 = vmatpush3.msra.mxu1 %v200_v39 }
 0x10f   :  { %509 = vmatprep.subr.mxu1 %v199_v40 }
 0x110   :  { %510 = vmatpush3.msra.mxu1 %v199_v40 }
 0x111   :  { %511 = vmatprep.subr.mxu1 %v198_v41 }
 0x112   :  { %512 = vmatpush3.msra.mxu1 %v198_v41 }
 0x113   :  { %514 = vmatmul.mubr.msk.f32.vlgmr.msra.gmra.mxu1 %vm222_vm1, %v611_v13  ;;  %519 = vmatprep.subr.mxu1 %v540_v42 }
 0x114   :  { %516 = vmatprep.mubr.msk.f32.mxu1 %vm222_vm1, %v600_v11 }
 0x117   :  { %517 = vmatmul.mubr.msk.f32.gmra.mxu1 %vm222_vm1, %v595_v10 }
 0x118   :  { %527 = vmatprep.mubr.msk.f32.mxu1 %vm541_vm2, %v540_v42 }
 0x1d3   :  { %v515_v44 = vpop.f32.mrf.mxu1 }
 0x1d4   :  { %v303_v51 = vadd.f32 %v515_v44, %v210_v49 }
 0x1d5   :  { %v297_v46 = vpop.f32.mrf.mxu1 }
 0x1d6   :  { %v298_v55 = vadd.f32 %v297_v46, %v205_v54  ;;  %v317_v57 = vmax.f32 %v303_v51, 0.0 }
 0x1d7   :  { %v518_v47 = vpop.f32.mrf.mxu1 }
 0x1d8   :  { %v313_v48 = vadd.f32 %v518_v47, %v220_v43  ;;  %v316_v58 = vmax.f32 %v298_v55, 0.0 }
 0x1d9   :  { %v307_v50 = vpop.f32.mrf.mxu1 }
 0x1da   :  { %v319_v52 = vmax.f32 %v313_v48, 0.0  ;;  %v308_v53 = vadd.f32 %v307_v50, %v215_v45 }
 0x1dc   :  { %v318_v56 = vmax.f32 %v308_v53, 0.0  ;;  %520 = vmatpush3.msra.mxu1 %v319_v52 }
 0x1dd   :  { %521 = vmatprep.subr.mxu1 %v540_v42 }
 0x1de   :  { %522 = vmatpush3.msra.mxu1 %v318_v56 }
 0x1df   :  { %523 = vmatprep.subr.mxu1 %v540_v42 }
 0x1e0   :  { %524 = vmatpush3.msra.mxu1 %v317_v57 }
 0x1e1   :  { %525 = vmatprep.subr.mxu1 %v540_v42 }
 0x1e2   :  { %526 = vmatpush3.msra.mxu1 %v316_v58 }
 0x1e3   :  { %528 = vmatmul.mubr.msk.f32.vlgmr.msra.gmra.mxu1 %vm222_vm1, %v626_v16 }
 0x2a3   :  { %v393_v60 = vpop.f32.mrf.mxu1 }
 0x2a4   :  { %v394_v61 = vadd.f32 %v393_v60, %v323_v59 }
 0x2a5   :  { %v529_v62 = vpop.f32.mrf.mxu1 }
 0x2a6   :  { %v433_v63 = vmul.f32 -1.442695, %v394_v61 }
 0x2a8   :  { %535 = vpow2.f32 %v433_v63 }
 0x2b5   :  { %v536_v0 = vpop.eup %535 }
 0x2b6   :  { %v400_v1 = vadd.f32 1.0, %v536_v0 }
 0x2b8   :  { %537 = vrcp.f32 %v400_v1 }
 0x2c5   :  { %v538_v2 = vpop.eup %537 }
 0x2c6   :  { %403 = vst [vmem:[%s694_s2] sm:$0xff] %v538_v2 }

</bundles_post_ra>
